<compile_context>
chip_gen: v7x
topology: tpu7x:2x2x1
jax: 0.10.0
libtpu: 0.0.40
codegen_flags: <defaults>
</compile_context>

<pallas_src>
import numpy as np
import jax
import jax.numpy as jnp
from jax.experimental import pallas as pl
from jax.experimental.pallas import tpu as pltpu


HIDDEN = 256
LANE = 128


def _cdiv(a, b):
    return (a + b - 1) // b


def _round_up(n, m):
    return _cdiv(n, m) * m


def detection_head_kernel(x_ref, w1_ref, b1_ref, w2_ref, b2_ref, o_ref):
    # fc1: cast the f32 x tile to bf16 just before the MXU dot; f32 accumulate.
    xb = x_ref[...].astype(jnp.bfloat16)
    h = jnp.dot(xb, w1_ref[...], preferred_element_type=jnp.float32)
    # Bias + ReLU in f32 on the VPU (v5e has no bf16 VALU).
    h = jnp.maximum(h + b1_ref[...], 0.0)
    # fc2: bf16 activation x bf16 weight -> f32 accumulate.
    out = jnp.dot(h.astype(jnp.bfloat16), w2_ref[...],
                  preferred_element_type=jnp.float32)
    o_ref[...] = (out + b2_ref[...]).astype(o_ref.dtype)


def prepare_params(w1, b1, w2, b2, lane_pad=LANE):
    """bf16 weights; fc2 output dim zero-padded up to a lane multiple (128)."""
    out_dim = w2.shape[1]
    padded = _round_up(out_dim, lane_pad)
    w2p = jnp.zeros((w2.shape[0], padded), jnp.bfloat16)
    w2p = w2p.at[:, :out_dim].set(w2.astype(jnp.bfloat16))
    b2p = jnp.zeros((1, padded), jnp.float32)
    b2p = b2p.at[:, :out_dim].set(b2.reshape(1, -1).astype(jnp.float32))
    return (w1.astype(jnp.bfloat16),
            b1.reshape(1, -1).astype(jnp.float32),
            w2p, b2p, out_dim)


def _choose_tile_b(B, cap=1024, min_grid=2):
    """Batch tile: large (amortize per-step overhead), 16-row aligned, and with
    a grid of >= 2 once B >= 32 so v7x's second TensorCore gets work."""
    if B <= 16:
        # Single block exactly covering the batch (block dim == array dim).
        return B
    num_tiles = max(_cdiv(B, cap), 1)
    if num_tiles < min_grid and B >= 16 * min_grid:
        num_tiles = min_grid
    return _round_up(_cdiv(B, num_tiles), 16)


def detection_head(x, params, tile_b=None, out_dtype=jnp.float32,
                   return_padded=False):
    """x: (B, fused_channels) f32 (or bf16). params: output of prepare_params().

    Returns (B, num_classes*7) by default; with return_padded=True returns the
    (B, 128) lane-padded buffer (valid columns are [:, :out_dim]) so the
    downstream consumer can fuse the slice instead of paying an extra HBM pass.
    """
    w1, b1, w2p, b2p, out_dim = params
    B, C = x.shape
    H = w1.shape[1]
    OUT_PAD = w2p.shape[1]

    if tile_b is None:
        tile_b = _choose_tile_b(B)
    else:
        tile_b = min(max(8, _round_up(tile_b, 8)), _round_up(B, 8))
    grid = (_cdiv(B, tile_b),)

    flops = 2 * B * (C * H + H * OUT_PAD)
    bytes_accessed = (x.size * x.dtype.itemsize
                      + w1.size * 2 + w2p.size * 2
                      + b1.size * 4 + b2p.size * 4
                      + B * OUT_PAD * np.dtype(out_dtype).itemsize)

    out = pl.pallas_call(
        detection_head_kernel,
        out_shape=jax.ShapeDtypeStruct((B, OUT_PAD), out_dtype),
        grid=grid,
        in_specs=[
            pl.BlockSpec((tile_b, C), lambda i: (i, 0)),   # x tile (pipelined)
            pl.BlockSpec((C, H), lambda i: (0, 0)),        # w1 (VMEM-resident)
            pl.BlockSpec((1, H), lambda i: (0, 0)),        # b1 (VMEM-resident)
            pl.BlockSpec((H, OUT_PAD), lambda i: (0, 0)),  # w2 (VMEM-resident)
            pl.BlockSpec((1, OUT_PAD), lambda i: (0, 0)),  # b2 (VMEM-resident)
        ],
        out_specs=pl.BlockSpec((tile_b, OUT_PAD), lambda i: (i, 0)),
        compiler_params=pltpu.CompilerParams(
            dimension_semantics=("parallel",)),
        cost_estimate=pl.CostEstimate(
            flops=flops, transcendentals=0, bytes_accessed=bytes_accessed),
    )(x, w1, b1, w2p, b2p)

    if return_padded:
        return out  # (B, OUT_PAD); valid columns are [:, :out_dim]
    return out[:, :out_dim]


def init_params(key, fused_channels=512, num_classes=3, hidden=HIDDEN):
    """Deterministic synthetic init (nn.Linear shapes, stored transposed)."""
    k1, k2, k3, k4 = jax.random.split(key, 4)
    lim1 = 1.0 / jnp.sqrt(fused_channels)
    lim2 = 1.0 / jnp.sqrt(hidden)
    w1 = jax.random.uniform(k1, (fused_channels, hidden), jnp.float32, -lim1, lim1)
    b1 = jax.random.uniform(k2, (1, hidden), jnp.float32, -lim1, lim1)
    w2 = jax.random.uniform(k3, (hidden, num_classes * 7), jnp.float32, -lim2, lim2)
    b2 = jax.random.uniform(k4, (1, num_classes * 7), jnp.float32, -lim2, lim2)
    return w1, b1, w2, b2


def ref_forward(x, w1, b1, w2, b2):
    """Reference matching the kernel's precision (bf16 operands, f32 accum)."""
    rt = lambda a: a.astype(jnp.bfloat16).astype(jnp.float32)
    h = jnp.maximum(rt(x) @ rt(w1) + b1.reshape(1, -1), 0.0)
    return rt(h) @ rt(w2) + b2.reshape(1, -1)


if __name__ == "__main__":
    key = jax.random.PRNGKey(0)
    kx, kp = jax.random.split(key)

    B, fused_channels, num_classes = 2, 512, 3
    x = jax.random.normal(kx, (B, fused_channels), jnp.float32)
    w1, b1, w2, b2 = init_params(kp, fused_channels, num_classes)
    params = prepare_params(w1, b1, w2, b2)

    out = jax.block_until_ready(detection_head(x, params))
    ref = ref_forward(x, w1, b1, w2, b2)
    assert out.shape == (B, num_classes * 7)
    assert jnp.allclose(out, ref, atol=1e-2, rtol=1e-2)

    # Multi-tile grid (grid=2, tile_b=32) with a partial boundary block (B=40).
    x2 = jax.random.normal(jax.random.PRNGKey(1), (40, fused_channels), jnp.float32)
    out2 = jax.block_until_ready(detection_head(x2, params))
    ref2 = ref_forward(x2, w1, b1, w2, b2)
    assert out2.shape == (40, num_classes * 7)
    assert jnp.allclose(out2, ref2, atol=1e-2, rtol=1e-2)

    # Lane-padded output path (downstream fuses the [:, :21] slice).
    out3 = jax.block_until_ready(detection_head(x2, params, return_padded=True))
    assert out3.shape == (40, LANE)
    assert jnp.allclose(out3[:, :num_classes * 7], ref2, atol=1e-2, rtol=1e-2)

    print("KERNEL_OK")
</pallas_src>

<mosaic_0001>
module attributes {stable_mosaic.version = 11 : i64} {
  func.func @detection_head_kernel(%arg0: i32, %arg1: memref<2x512xf32, #tpu.memory_space<vmem>>, %arg2: memref<512x256xbf16, #tpu.memory_space<vmem>>, %arg3: memref<1x256xf32, #tpu.memory_space<vmem>>, %arg4: memref<256x128xbf16, #tpu.memory_space<vmem>>, %arg5: memref<1x128xf32, #tpu.memory_space<vmem>>, %arg6: memref<2x128xf32, #tpu.memory_space<vmem>>) attributes {dimension_semantics = [#tpu.dimension_semantics<parallel>], iteration_bounds = array<i64: 1>, scalar_prefetch = 0 : i64, scratch_operands = 0 : i64, tpu.core_type = #tpu.core_type<tc>, window_params = [{transform_indices = @transform_0, window_bounds = array<i64: 2, 512>}, {pipeline_mode = #tpu.pipeline_mode<synchronous>, transform_indices = @transform_1, window_bounds = array<i64: 512, 256>}, {pipeline_mode = #tpu.pipeline_mode<synchronous>, transform_indices = @transform_2, window_bounds = array<i64: 1, 256>}, {pipeline_mode = #tpu.pipeline_mode<synchronous>, transform_indices = @transform_3, window_bounds = array<i64: 256, 128>}, {pipeline_mode = #tpu.pipeline_mode<synchronous>, transform_indices = @transform_4, window_bounds = array<i64: 1, 128>}, {transform_indices = @transform_5, window_bounds = array<i64: 2, 128>}]} {
    %c0 = arith.constant 0 : index
    %c0_0 = arith.constant 0 : index
    %0 = vector.load %arg1[%c0, %c0_0] : memref<2x512xf32, #tpu.memory_space<vmem>>, vector<2x512xf32>
    %1 = arith.truncf %0 : vector<2x512xf32> to vector<2x512xbf16>
    %c0_1 = arith.constant 0 : index
    %c0_2 = arith.constant 0 : index
    %2 = vector.load %arg2[%c0_1, %c0_2] : memref<512x256xbf16, #tpu.memory_space<vmem>>, vector<512x256xbf16>
    %cst = arith.constant dense<0.000000e+00> : vector<2x256xf32>
    %3 = tpu.matmul %1, %2, %cst {dimension_numbers = #tpu.dot_dimension_numbers<[1], [0], [0], [1], [0, 0, 1, 1], [], []>} : vector<2x512xbf16>, vector<512x256xbf16>, vector<2x256xf32> -> vector<2x256xf32>
    %c0_3 = arith.constant 0 : index
    %c0_4 = arith.constant 0 : index
    %4 = vector.load %arg3[%c0_3, %c0_4] : memref<1x256xf32, #tpu.memory_space<vmem>>, vector<1x256xf32>
    %5 = vector.broadcast %4 : vector<1x256xf32> to vector<2x256xf32>
    %6 = arith.addf %3, %5 : vector<2x256xf32>
    %cst_5 = arith.constant 0.000000e+00 : f32
    %7 = vector.broadcast %cst_5 : f32 to vector<2x256xf32>
    %8 = arith.maximumf %6, %7 : vector<2x256xf32>
    %9 = arith.truncf %8 : vector<2x256xf32> to vector<2x256xbf16>
    %c0_6 = arith.constant 0 : index
    %c0_7 = arith.constant 0 : index
    %10 = vector.load %arg4[%c0_6, %c0_7] : memref<256x128xbf16, #tpu.memory_space<vmem>>, vector<256x128xbf16>
    %cst_8 = arith.constant dense<0.000000e+00> : vector<2x128xf32>
    %11 = tpu.matmul %9, %10, %cst_8 {dimension_numbers = #tpu.dot_dimension_numbers<[1], [0], [0], [1], [0, 0, 1, 1], [], []>} : vector<2x256xbf16>, vector<256x128xbf16>, vector<2x128xf32> -> vector<2x128xf32>
    %c0_9 = arith.constant 0 : index
    %c0_10 = arith.constant 0 : index
    %12 = vector.load %arg5[%c0_9, %c0_10] : memref<1x128xf32, #tpu.memory_space<vmem>>, vector<1x128xf32>
    %13 = vector.broadcast %12 : vector<1x128xf32> to vector<2x128xf32>
    %14 = arith.addf %11, %13 : vector<2x128xf32>
    %c0_11 = arith.constant 0 : index
    %c0_12 = arith.constant 0 : index
    %15 = vector.load %arg6[%c0_11, %c0_12] : memref<2x128xf32, #tpu.memory_space<vmem>>, vector<2x128xf32>
    tpu.vector_store %arg6[%c0_11, %c0_12], %14 {strides = array<i32>} : memref<2x128xf32, #tpu.memory_space<vmem>>, vector<2x128xf32>,
    return
  }
  func.func @transform_0(%arg0: i32) -> (i32, i32) {
    %c0_i32 = arith.constant 0 : i32
    %c0_i32_0 = arith.constant 0 : i32
    return %arg0, %c0_i32 : i32, i32
  }
  func.func @transform_1(%arg0: i32) -> (i32, i32) {
    %c0_i32 = arith.constant 0 : i32
    %c0_i32_0 = arith.constant 0 : i32
    %c0_i32_1 = arith.constant 0 : i32
    return %c0_i32, %c0_i32_0 : i32, i32
  }
  func.func @transform_2(%arg0: i32) -> (i32, i32) {
    %c0_i32 = arith.constant 0 : i32
    %c0_i32_0 = arith.constant 0 : i32
    %c0_i32_1 = arith.constant 0 : i32
    return %c0_i32, %c0_i32_0 : i32, i32
  }
  func.func @transform_3(%arg0: i32) -> (i32, i32) {
    %c0_i32 = arith.constant 0 : i32
    %c0_i32_0 = arith.constant 0 : i32
    %c0_i32_1 = arith.constant 0 : i32
    return %c0_i32, %c0_i32_0 : i32, i32
  }
  func.func @transform_4(%arg0: i32) -> (i32, i32) {
    %c0_i32 = arith.constant 0 : i32
    %c0_i32_0 = arith.constant 0 : i32
    %c0_i32_1 = arith.constant 0 : i32
    return %c0_i32, %c0_i32_0 : i32, i32
  }
  func.func @transform_5(%arg0: i32) -> (i32, i32) {
    %c0_i32 = arith.constant 0 : i32
    %c0_i32_0 = arith.constant 0 : i32
    return %arg0, %c0_i32 : i32, i32
  }
}

</mosaic_0001>

<bundles_post_ra>
// kernel: tpu_custom_call.1
= control target key start
LH: loop header
LB: loop body
LE: loop exit
PB: predicated region body
PF: predicated region fallthrough
CT: control target
= control target key end

     0   :  { %10 = vsyncpa [#allocation3], 0  ;;  %s1183_s0 = inlined_call_operand.hbm [shape: f32[2,512], index: 0, kind: input, shape index: {}]   ;;  %s1184_s1 = inlined_call_operand.hbm [shape: bf16[512,256], index: 1, kind: input, shape index: {}]   ;;  %s1185_s2 = inlined_call_operand.vmem [shape: f32[1,256], index: 2, kind: input, shape index: {}]   ;;  %s1186_s3 = inlined_call_operand.hbm [shape: bf16[256,128], index: 3, kind: input, shape index: {}]   ;;  %s1187_s4 = inlined_call_operand.vmem [shape: f32[1,128], index: 4, kind: input, shape index: {}]   ;;  %s1188_s5 = inlined_call_operand.hbm [shape: f32[2,128], index: 5, kind: output, shape index: {}]  }
   0x1   :  { %11 = vsyncpa [#allocation6], 0 }
   0x2   :  { %12 = vsyncpa [#allocation4], 0  ;;  %s1085_s18 = smov [#allocation5]   ;;  %s991_s22 = scalar_lea.hbm %s1184_s1, 8192 }
   0x3   :  { %s28_s19 = sshll.u32 %s1085_s18, 4  ;;  %p992_p0 = scmp.ne.s32.totalorder %s1184_s1, %s991_s22  ;;  %s29_s19 = int_to_ptr.vmem [resolvable:$true] %s28_s19 }
   0x4   :  { %p995_p1 = scmp.lt.u32.totalorder %s991_s22, %s1184_s1 }
   0x6   :  { %p997_p2 = pnand %p995_p1, %p992_p0 }
   0x8   :  { %1000 = shalt.err (!%p997_p2)
}
   0x9   :  { %s1001_s27 = scalar_lea.vmem %s29_s19, 8192  ;;  %p1006_p4 = scmp.lt.s32.totalorder %s29_s19, %s29_s19 }
   0xa   :  { %p1002_p3 = scmp.ne.s32.totalorder %s29_s19, %s1001_s27  ;;  %p1007_p5 = scmp.lt.s32.totalorder %s1001_s27, %s1001_s27 }
   0xc   :  { %p1008_p6 = por %p1007_p5, %p1006_p4 }
   0xe   :  { %p1009_p7 = pnand %p1008_p6, %p1002_p3 }
  0x10   :  { %1012 = shalt.err (!%p1009_p7)
}
  0x11   :  { %s1086_s28 = smov 128   ;;  %s1087_s29 = smov 8  }
  0x12   :  { %34 = dma.hbm_to_vmem [thread:$0]  %s1184_s1, 8192, %s29_s19, [#allocation6], %s1086_s28, %s1086_s28, %s1087_s29  }
  0x13   :  { %s1088_s7 = smov [#allocation2]   ;;  %s1089_s9 = smov [#allocation7]  }
  0x14   :  { %s19_s8 = sshll.u32 %s1088_s7, 4  ;;  %s42_s10 = sshll.u32 %s1089_s9, 4  ;;  %s20_s8 = int_to_ptr.vmem [resolvable:$true] %s19_s8  ;;  %s43_s10 = int_to_ptr.vmem [resolvable:$true] %s42_s10 }
  0x15   :  { %s1013_s13 = scalar_lea.hbm %s1183_s0, 128 }
  0x16   :  { %p1014_p8 = scmp.ne.s32.totalorder %s1183_s0, %s1013_s13  ;;  %p1017_p9 = scmp.lt.u32.totalorder %s1013_s13, %s1183_s0 }
  0x18   :  { %p1019_p10 = pnand %p1017_p9, %p1014_p8 }
  0x1a   :  { %1022 = shalt.err (!%p1019_p10)
}
  0x1b   :  { %s1023_s1 = scalar_lea.vmem %s20_s8, 128  ;;  %p1028_p12 = scmp.lt.s32.totalorder %s20_s8, %s20_s8 }
  0x1c   :  { %p1024_p11 = scmp.ne.s32.totalorder %s20_s8, %s1023_s1  ;;  %p1029_p13 = scmp.lt.s32.totalorder %s1023_s1, %s1023_s1 }
  0x1e   :  { %p1030_p0 = por %p1029_p13, %p1028_p12 }
  0x20   :  { %p1031_p1 = pnand %p1030_p0, %p1024_p11 }
  0x22   :  { %1034 = shalt.err (!%p1031_p1)
}
  0x23   :  { %22 = dma.hbm_to_vmem [thread:$0]  %s1183_s0, 128, %s20_s8, [#allocation3]  }
  0x24   :  { %s1035_s22 = scalar_lea.hbm %s1186_s3, 2048 }
  0x25   :  { %p1036_p2 = scmp.ne.s32.totalorder %s1186_s3, %s1035_s22  ;;  %p1039_p3 = scmp.lt.u32.totalorder %s1035_s22, %s1186_s3 }
  0x27   :  { %p1041_p4 = pnand %p1039_p3, %p1036_p2 }
  0x29   :  { %1044 = shalt.err (!%p1041_p4)
}
  0x2a   :  { %s1045_s27 = scalar_lea.vmem %s43_s10, 2048  ;;  %p1050_p6 = scmp.lt.s32.totalorder %s43_s10, %s43_s10 }
  0x2b   :  { %p1046_p5 = scmp.ne.s32.totalorder %s43_s10, %s1045_s27  ;;  %p1051_p7 = scmp.lt.s32.totalorder %s1045_s27, %s1045_s27 }
  0x2d   :  { %p1052_p8 = por %p1051_p7, %p1050_p6 }
  0x2f   :  { %p1053_p9 = pnand %p1052_p8, %p1046_p5 }
  0x31   :  { %1056 = shalt.err (!%p1053_p9)
}
  0x32   :  { %s1090_s0 = smov 64   ;;  %s1091_s28 = smov 4  }
  0x33   :  { %48 = dma.hbm_to_vmem [thread:$0]  %s1186_s3, 2048, %s43_s10, [#allocation6], %s1090_s0, %s1090_s0, %s1091_s28  }
  0x34   :  { %1079 = dma.done.wait [#allocation3], 128  }
  0x35   :  { %1080 = vsyncadd [#allocation3], 4294967168 }
  0x36   :  { %1081 = dma.done.wait [#allocation6], 10240  }
  0x37   :  { %1082 = vsyncadd [#allocation6], 4294957056  ;;  %v878_v0 = vld [vmem:[#allocation5 + $0x4] ss:$8 sps:$4 sm:$0xff]   ;;  %v882_v2 = vld [vmem:[#allocation5] ss:$8 sps:$4 sm:$0xff]   ;;  %v67_v38 = vlaneseq }
  0x38   :  { %v880_v1 = vld [vmem:[#allocation5 + $0x104] ss:$8 sps:$4 sm:$0xff]   ;;  %484 = vmatprep.subr.bf16.mxu1 %v878_v0  ;;  %v883_v3 = vld [vmem:[#allocation5 + $0x100] ss:$8 sps:$4 sm:$0xff]   ;;  %v884_v4 = vld [vmem:[#allocation5 + $0x14] ss:$8 sps:$4 sm:$0xff]  }
  0x39   :  { %525 = vmatprep.subr.bf16.mxu0 %v880_v1  ;;  %485 = vmatpush1.bf16.msra.mxu1 %v882_v2  ;;  %v886_v5 = vld [vmem:[#allocation5 + $0x114] ss:$8 sps:$4 sm:$0xff]   ;;  %v888_v6 = vld [vmem:[#allocation5 + $0x10] ss:$8 sps:$4 sm:$0xff]   ;;  %v890_v8 = vld [vmem:[#allocation5 + $0x24] ss:$8 sps:$4 sm:$0xff]  }
  0x3a   :  { %526 = vmatpush1.bf16.msra.mxu0 %v883_v3  ;;  %486 = vmatprep.subr.bf16.mxu1 %v884_v4  ;;  %v889_v7 = vld [vmem:[#allocation5 + $0x110] ss:$8 sps:$4 sm:$0xff]   ;;  %v892_v9 = vld [vmem:[#allocation5 + $0x124] ss:$8 sps:$4 sm:$0xff]   ;;  %v894_v10 = vld [vmem:[#allocation5 + $0x20] ss:$8 sps:$4 sm:$0xff]  }
  0x3b   :  { %527 = vmatprep.subr.bf16.mxu0 %v886_v5  ;;  %v895_v11 = vld [vmem:[#allocation5 + $0x120] ss:$8 sps:$4 sm:$0xff]   ;;  %v896_v12 = vld [vmem:[#allocation5 + $0x34] ss:$8 sps:$4 sm:$0xff]   ;;  %v900_v14 = vld [vmem:[#allocation5 + $0x30] ss:$8 sps:$4 sm:$0xff]  }
  0x3c   :  { %v898_v13 = vld [vmem:[#allocation5 + $0x134] ss:$8 sps:$4 sm:$0xff]   ;;  %v901_v15 = vld [vmem:[#allocation5 + $0x130] ss:$8 sps:$4 sm:$0xff]   ;;  %v902_v16 = vld [vmem:[#allocation5 + $0x44] ss:$8 sps:$4 sm:$0xff]  }
  0x3d   :  { %487 = vmatpush1.bf16.msra.mxu1 %v888_v6  ;;  %v904_v17 = vld [vmem:[#allocation5 + $0x144] ss:$8 sps:$4 sm:$0xff]   ;;  %v906_v18 = vld [vmem:[#allocation5 + $0x40] ss:$8 sps:$4 sm:$0xff]   ;;  %v908_v20 = vld [vmem:[#allocation5 + $0x54] ss:$8 sps:$4 sm:$0xff]  }
  0x3e   :  { %528 = vmatpush1.bf16.msra.mxu0 %v889_v7  ;;  %488 = vmatprep.subr.bf16.mxu1 %v890_v8  ;;  %v907_v19 = vld [vmem:[#allocation5 + $0x140] ss:$8 sps:$4 sm:$0xff]   ;;  %v910_v21 = vld [vmem:[#allocation5 + $0x154] ss:$8 sps:$4 sm:$0xff]   ;;  %v912_v22 = vld [vmem:[#allocation5 + $0x50] ss:$8 sps:$4 sm:$0xff]  }
  0x3f   :  { %529 = vmatprep.subr.bf16.mxu0 %v892_v9  ;;  %v913_v23 = vld [vmem:[#allocation5 + $0x150] ss:$8 sps:$4 sm:$0xff]   ;;  %v914_v24 = vld [vmem:[#allocation5 + $0x64] ss:$8 sps:$4 sm:$0xff]   ;;  %v918_v26 = vld [vmem:[#allocation5 + $0x60] ss:$8 sps:$4 sm:$0xff]  }
  0x40   :  { %v916_v25 = vld [vmem:[#allocation5 + $0x164] ss:$8 sps:$4 sm:$0xff]   ;;  %v919_v27 = vld [vmem:[#allocation5 + $0x160] ss:$8 sps:$4 sm:$0xff]   ;;  %v920_v28 = vld [vmem:[#allocation5 + $0x74] ss:$8 sps:$4 sm:$0xff]  }
  0x41   :  { %489 = vmatpush1.bf16.msra.mxu1 %v894_v10  ;;  %v922_v29 = vld [vmem:[#allocation5 + $0x174] ss:$8 sps:$4 sm:$0xff]   ;;  %v924_v30 = vld [vmem:[#allocation5 + $0x70] ss:$8 sps:$4 sm:$0xff]   ;;  %v926_v32 = vld [vmem:[#allocation5 + $0x84] ss:$8 sps:$4 sm:$0xff]  }
  0x42   :  { %530 = vmatpush1.bf16.msra.mxu0 %v895_v11  ;;  %490 = vmatprep.subr.bf16.mxu1 %v896_v12  ;;  %v925_v31 = vld [vmem:[#allocation5 + $0x170] ss:$8 sps:$4 sm:$0xff]   ;;  %v928_v33 = vld [vmem:[#allocation5 + $0x184] ss:$8 sps:$4 sm:$0xff]   ;;  %v930_v34 = vld [vmem:[#allocation5 + $0x80] ss:$8 sps:$4 sm:$0xff]  }
  0x43   :  { %531 = vmatprep.subr.bf16.mxu0 %v898_v13  ;;  %v931_v35 = vld [vmem:[#allocation5 + $0x180] ss:$8 sps:$4 sm:$0xff]   ;;  %v1092_v36 = vmov 1983009808   ;;  %v932_v39 = vld [vmem:[#allocation5 + $0x94] ss:$8 sps:$4 sm:$0xff]  }
  0x44   :  { %v65_v37 = vunpack.c.l.s4 %v1092_v36  ;;  %v934_v40 = vld [vmem:[#allocation5 + $0x194] ss:$8 sps:$4 sm:$0xff]   ;;  %v936_v41 = vld [vmem:[#allocation5 + $0x90] ss:$8 sps:$4 sm:$0xff]   ;;  %v1160_v43 = vshrl.u32 %v67_v38, 7  ;;  %s1093_s8 = smov [#allocation8]  }
  0x45   :  { %491 = vmatpush1.bf16.msra.mxu1 %v900_v14  ;;  %v937_v44 = vld [vmem:[#allocation5 + $0x190] ss:$8 sps:$4 sm:$0xff]   ;;  %v938_v45 = vld [vmem:[#allocation5 + $0xa4] ss:$8 sps:$4 sm:$0xff]   ;;  %v942_v47 = vld [vmem:[#allocation5 + $0xa0] ss:$8 sps:$4 sm:$0xff]  }
  0x46   :  { %532 = vmatpush1.bf16.msra.mxu0 %v901_v15  ;;  %492 = vmatprep.subr.bf16.mxu1 %v902_v16  ;;  %v66_v42 = vunpack.c.0.s8 %v65_v37  ;;  %v940_v46 = vld [vmem:[#allocation5 + $0x1a4] ss:$8 sps:$4 sm:$0xff]   ;;  %v943_v48 = vld [vmem:[#allocation5 + $0x1a0] ss:$8 sps:$4 sm:$0xff]   ;;  %v944_v50 = vld [vmem:[#allocation5 + $0xb4] ss:$8 sps:$4 sm:$0xff]  }
  0x47   :  { %533 = vmatprep.subr.bf16.mxu0 %v904_v17  ;;  %v946_v51 = vld [vmem:[#allocation5 + $0x1b4] ss:$8 sps:$4 sm:$0xff]   ;;  %v948_v52 = vld [vmem:[#allocation5 + $0xb0] ss:$8 sps:$4 sm:$0xff]   ;;  %v950_v57 = vld [vmem:[#allocation5 + $0xc4] ss:$8 sps:$4 sm:$0xff]  }
  0x48   :  { %v69_v49 = vsub.s32 %v66_v42, %v1160_v43  ;;  %v61_v53 = vld [vmem:[#allocation2] sm:$0xff]  ;;  %v952_v58 = vld [vmem:[#allocation5 + $0x1c4] ss:$8 sps:$4 sm:$0xff]   ;;  %v954_v61 = vld [vmem:[#allocation5 + $0xc0] ss:$8 sps:$4 sm:$0xff]   ;;  %s752_s9 = sshll.u32 %s1093_s8, 4  ;;  %s753_s9 = int_to_ptr.vmem [resolvable:$true] %s752_s9 }
  0x49   :  { %493 = vmatpush1.bf16.msra.mxu1 %v906_v18  ;;  %v949_v54 = vld [vmem:[#allocation5 + $0x1b0] ss:$8 sps:$4 sm:$0xff]   ;;  %v63_v56 = vcombine.high %v61_v53, %v61_v53  ;;  %v955_v62 = vld [vmem:[#allocation5 + $0x1c0] ss:$8 sps:$4 sm:$0xff]   ;;  %v956_v1 = vld [vmem:[#allocation5 + $0xd4] ss:$8 sps:$4 sm:$0xff]   ;;  %p1062_p11 = scmp.lt.s32.totalorder %s753_s9, %s753_s9 }
  0x4a   :  { %534 = vmatpush1.bf16.msra.mxu0 %v907_v19  ;;  %494 = vmatprep.subr.bf16.mxu1 %v908_v20  ;;  %v70_v55 = vrot.slane %v61_v53, %v69_v49  ;;  %v958_v2 = vld [vmem:[#allocation5 + $0x1d4] ss:$8 sps:$4 sm:$0xff]   ;;  %v960_v4 = vld [vmem:[#allocation5 + $0xd0] ss:$8 sps:$4 sm:$0xff]   ;;  %v962_v6 = vld [vmem:[#allocation5 + $0xe4] ss:$8 sps:$4 sm:$0xff]  }
  0x4b   :  { %535 = vmatprep.subr.bf16.mxu0 %v910_v21  ;;  %v77_v60 = vrot.slane %v63_v56, %v69_v49  ;;  %v961_v5 = vld [vmem:[#allocation5 + $0x1d0] ss:$8 sps:$4 sm:$0xff]   ;;  %v964_v7 = vld [vmem:[#allocation5 + $0x1e4] ss:$8 sps:$4 sm:$0xff]   ;;  %v966_v8 = vld [vmem:[#allocation5 + $0xe0] ss:$8 sps:$4 sm:$0xff]  }
  0x4c   :  { %v78_v59 = vcombine.high %v70_v55, %v70_v55  ;;  %v967_v9 = vld [vmem:[#allocation5 + $0x1e0] ss:$8 sps:$4 sm:$0xff]   ;;  %v968_v10 = vld [vmem:[#allocation5 + $0xf4] ss:$8 sps:$4 sm:$0xff]   ;;  %v972_v12 = vld [vmem:[#allocation5 + $0xf0] ss:$8 sps:$4 sm:$0xff]   ;;  %v84_v15 = vpack.c.bf16 %v70_v55, %v70_v55 }
  0x4d   :  { %495 = vmatpush1.bf16.msra.mxu1 %v912_v22  ;;  %v79_v0 = vcombine.high %v77_v60, %v77_v60  ;;  %v970_v11 = vld [vmem:[#allocation5 + $0x1f4] ss:$8 sps:$4 sm:$0xff]   ;;  %v973_v13 = vld [vmem:[#allocation5 + $0x1f0] ss:$8 sps:$4 sm:$0xff]   ;;  %v975_v14 = vld [vmem:[#allocation7 + $0x40] sm:$0xff]   ;;  %v86_v16 = vpack.c.bf16 %v77_v60, %v77_v60  ;;  %s1057_s10 = scalar_lea.vmem %s753_s9, 32 }
  0x4e   :  { %536 = vmatpush1.bf16.msra.mxu0 %v913_v23  ;;  %496 = vmatprep.subr.bf16.mxu1 %v914_v24  ;;  %v85_v63 = vpack.c.bf16 %v78_v59, %v78_v59  ;;  %v976_v17 = vld [vmem:[#allocation7] sm:$0xff]   ;;  %v977_v18 = vld [vmem:[#allocation7 + $0x48] sm:$0xff]   ;;  %v979_v20 = vld [vmem:[#allocation7 + $0x50] sm:$0xff]   ;;  %p1058_p10 = scmp.ne.s32.totalorder %s753_s9, %s1057_s10  ;;  %p1063_p12 = scmp.lt.s32.totalorder %s1057_s10, %s1057_s10 }
  0x4f   :  { %537 = vmatprep.subr.bf16.mxu0 %v916_v25  ;;  %v87_v3 = vpack.c.bf16 %v79_v0, %v79_v0  ;;  %v978_v19 = vld [vmem:[#allocation7 + $0x8] sm:$0xff]   ;;  %v980_v21 = vld [vmem:[#allocation7 + $0x10] sm:$0xff]   ;;  %v981_v22 = vld [vmem:[#allocation7 + $0x58] sm:$0xff]  }
  0x50   :  { %516 = vmatprep.mubr.bf16.mxu1 %v85_v63  ;;  %v982_v23 = vld [vmem:[#allocation7 + $0x18] sm:$0xff]   ;;  %v983_v24 = vld [vmem:[#allocation7 + $0x60] sm:$0xff]   ;;  %p1064_p13 = por %p1063_p12, %p1062_p11 }
  0x51   :  { %497 = vmatpush1.bf16.msra.mxu1 %v918_v26  ;;  %557 = vmatprep.mubr.bf16.mxu0 %v87_v3  ;;  %v984_v25 = vld [vmem:[#allocation7 + $0x20] sm:$0xff]   ;;  %v985_v26 = vld [vmem:[#allocation7 + $0x68] sm:$0xff]  }
  0x52   :  { %538 = vmatpush1.bf16.msra.mxu0 %v919_v27  ;;  %498 = vmatprep.subr.bf16.mxu1 %v920_v28  ;;  %v986_v27 = vld [vmem:[#allocation7 + $0x28] sm:$0xff]   ;;  %v987_v28 = vld [vmem:[#allocation7 + $0x70] sm:$0xff]   ;;  %p1065_p0 = pnand %p1064_p13, %p1058_p10 }
  0x53   :  { %539 = vmatprep.subr.bf16.mxu0 %v922_v29  ;;  %v988_v29 = vld [vmem:[#allocation7 + $0x30] sm:$0xff]  }
  0x55   :  { %499 = vmatpush1.bf16.msra.mxu1 %v924_v30  ;;  %v989_v30 = vld [vmem:[#allocation7 + $0x78] sm:$0xff]  }
  0x56   :  { %540 = vmatpush1.bf16.msra.mxu0 %v925_v31  ;;  %500 = vmatprep.subr.bf16.mxu1 %v926_v32  ;;  %v990_v31 = vld [vmem:[#allocation7 + $0x38] sm:$0xff]   ;;  %v156_v32 = vsub.s32 0, %v1160_v43 }
  0x57   :  { %541 = vmatprep.subr.bf16.mxu0 %v928_v33  ;;  %v152_v33 = vld [vmem:[%s1185_s2] sm:$0x3] }
  0x59   :  { %501 = vmatpush1.bf16.msra.mxu1 %v930_v34  ;;  %v160_v34 = vsub.s32 1, %v1160_v43 }
  0x5a   :  { %542 = vmatpush1.bf16.msra.mxu0 %v931_v35  ;;  %502 = vmatprep.subr.bf16.mxu1 %v932_v39  ;;  %v157_v35 = vrot.slane %v152_v33, %v156_v32 }
  0x5b   :  { %543 = vmatprep.subr.bf16.mxu0 %v934_v40  ;;  %v161_v36 = vrot.slane %v152_v33, %v160_v34 }
  0x5d   :  { %503 = vmatpush1.bf16.msra.mxu1 %v936_v41 }
  0x5e   :  { %544 = vmatpush1.bf16.msra.mxu0 %v937_v44  ;;  %504 = vmatprep.subr.bf16.mxu1 %v938_v45 }
  0x5f   :  { %545 = vmatprep.subr.bf16.mxu0 %v940_v46 }
  0x61   :  { %505 = vmatpush1.bf16.msra.mxu1 %v942_v47 }
  0x62   :  { %546 = vmatpush1.bf16.msra.mxu0 %v943_v48  ;;  %506 = vmatprep.subr.bf16.mxu1 %v944_v50 }
  0x63   :  { %547 = vmatprep.subr.bf16.mxu0 %v946_v51 }
  0x65   :  { %507 = vmatpush1.bf16.msra.mxu1 %v948_v52 }
  0x66   :  { %548 = vmatpush1.bf16.msra.mxu0 %v949_v54  ;;  %508 = vmatprep.subr.bf16.mxu1 %v950_v57  ;;  %v826_v54 = vld [vmem:[%s1187_s4] ss:$0 sm:$0xff] }
  0x67   :  { %549 = vmatprep.subr.bf16.mxu0 %v952_v58 }
  0x69   :  { %509 = vmatpush1.bf16.msra.mxu1 %v954_v61 }
  0x6a   :  { %550 = vmatpush1.bf16.msra.mxu0 %v955_v62  ;;  %510 = vmatprep.subr.bf16.mxu1 %v956_v1 }
  0x6b   :  { %551 = vmatprep.subr.bf16.mxu0 %v958_v2 }
  0x6d   :  { %511 = vmatpush1.bf16.msra.mxu1 %v960_v4 }
  0x6e   :  { %552 = vmatpush1.bf16.msra.mxu0 %v961_v5  ;;  %512 = vmatprep.subr.bf16.mxu1 %v962_v6 }
  0x6f   :  { %553 = vmatprep.subr.bf16.mxu0 %v964_v7 }
  0x71   :  { %513 = vmatpush1.bf16.msra.mxu1 %v966_v8 }
  0x72   :  { %554 = vmatpush1.bf16.msra.mxu0 %v967_v9  ;;  %514 = vmatprep.subr.bf16.mxu1 %v968_v10 }
  0x73   :  { %555 = vmatprep.subr.bf16.mxu0 %v970_v11 }
  0x75   :  { %515 = vmatpush1.bf16.msra.mxu1 %v972_v12 }
  0x76   :  { %556 = vmatpush1.bf16.msra.mxu0 %v973_v13  ;;  %843 = vmatprep.subr.bf16.mxu1 %v975_v14 }
  0x78   :  { %517 = vmatmul.mubr.bf16.vlgmr.msra.gmra.mrb[0].mxu1 %v84_v15 }
  0x79   :  { %558 = vmatmul.mubr.bf16.vlgmr.msra.gmra.mrb[0].mxu0 %v86_v16  ;;  %844 = vmatpush3.bf16.msra.mxu1 %v976_v17 }
  0x7a   :  { %845 = vmatprep.subr.bf16.mxu1 %v977_v18 }
  0x7d   :  { %846 = vmatpush3.bf16.msra.mxu1 %v978_v19 }
  0x7e   :  { %847 = vmatprep.subr.bf16.mxu1 %v979_v20 }
  0x81   :  { %848 = vmatpush3.bf16.msra.mxu1 %v980_v21 }
  0x82   :  { %849 = vmatprep.subr.bf16.mxu1 %v981_v22 }
  0x85   :  { %850 = vmatpush3.bf16.msra.mxu1 %v982_v23 }
  0x86   :  { %851 = vmatprep.subr.bf16.mxu1 %v983_v24 }
  0x89   :  { %852 = vmatpush3.bf16.msra.mxu1 %v984_v25 }
  0x8a   :  { %853 = vmatprep.subr.bf16.mxu1 %v985_v26 }
  0x8d   :  { %854 = vmatpush3.bf16.msra.mxu1 %v986_v27 }
  0x8e   :  { %855 = vmatprep.subr.bf16.mxu1 %v987_v28 }
  0x91   :  { %856 = vmatpush3.bf16.msra.mxu1 %v988_v29 }
  0x92   :  { %857 = vmatprep.subr.bf16.mxu1 %v989_v30 }
  0x95   :  { %858 = vmatpush3.bf16.msra.mxu1 %v990_v31 }
 0x14b   :  { %v518_v37 = vpop.f32.mrb[0].mxu1 }
 0x14c   :  { %v559_v38 = vpop.f32.mrb[0].mxu0  ;;  %v519_v39 = vadd.f32 %v518_v37, %v157_v35  ;;  %v520_v40 = vpop.f32.mrb[1].mxu1 }
 0x14d   :  { %v561_v41 = vpop.f32.mrb[1].mxu0  ;;  %v521_v42 = vadd.f32 %v520_v40, %v161_v36  ;;  %v522_v44 = vpop.f32.mrb[2].mxu1 }
 0x14e   :  { %v563_v45 = vpop.f32.mrb[2].mxu0  ;;  %v560_v46 = vadd.f32 %v559_v38, %v519_v39  ;;  %v523_v47 = vpop.f32.mrb[3].mxu1 }
 0x14f   :  { %v564_v48 = vpop.f32.mrb[3].mxu0  ;;  %v562_v49 = vadd.f32 %v561_v41, %v521_v42 }
 0x150   :  { %v566_v50 = vmax.f32 %v560_v46, 0.0 }
 0x151   :  { %v567_v51 = vmax.f32 %v562_v49, 0.0 }
 0x152   :  { %v568_v53 = vpack.c.bf16 %v566_v50, %v566_v50 }
 0x153   :  { %v569_v52 = vpack.c.bf16 %v567_v51, %v567_v51 }
 0x155   :  { %737 = vmatprep.mubr.bf16.mxu1 %v569_v52 }
 0x156   :  { %738 = vmatmul.mubr.bf16.vlgmr.msra.gmra.mrb[4].mxu1 %v568_v53 }
 0x229   :  { %v859_v43 = vpop.f32.mrb[4].mxu1 }
 0x22a   :  { %v860_v55 = vpop.f32.mrb[5].mxu1 }
 0x22b   :  { %v861_v56 = vadd.f32 %v860_v55, %v859_v43  ;;  %v862_v57 = vpop.f32.mrb[6].mxu1 }
 0x22c   :  { %v863_v58 = vpop.f32.mrb[7].mxu1 }
 0x22d   :  { %v740_v59 = vadd.f32 %v861_v56, %v826_v54 }
 0x22f   :  { %745 = vst [vmem:[#allocation8] sm:$0x3] %v740_v59 }
 0x230   :  { %1068 = shalt.err (!%p1065_p0)
}
 0x231   :  { %s1069_s4 = scalar_lea.hbm %s1188_s5, 32 }
 0x232   :  { %p1070_p1 = scmp.ne.s32.totalorder %s1188_s5, %s1069_s4  ;;  %p1073_p2 = scmp.lt.u32.totalorder %s1069_s4, %s1188_s5 }
 0x234   :  { %p1075_p3 = pnand %p1073_p2, %p1070_p1 }
 0x236   :  { %1078 = shalt.err (!%p1075_p3)
}
 0x237   :  { %755 = dma.vmem_to_hbm [thread:$0]  %s753_s9, 32, %s1188_s5, [#allocation4]  }
 0x238   :  { %1083 = dma.done.wait [#allocation4], 32  }
 0x239   :  { %1084 = vsyncadd [#allocation4], 4294967264 }
 0x23a   :  { %759 = vsyncpa [#allocation3], 1 }
 0x23b   :  { %760 = vsyncpa [#allocation6], 1 }
 0x23c   :  { %761 = vsyncpa [#allocation4], 1 }

</bundles_post_ra>
